<compile_context>
chip_gen: v6e
topology: v6e:2x2x1
jax: 0.10.0
libtpu: 0.0.40
codegen_flags: <defaults>
</compile_context>

<pallas_src>
import functools
import math

import jax
import jax.numpy as jnp
from jax.experimental import pallas as pl
from jax.experimental.pallas import tpu as pltpu


def _round_up(x, m):
    return ((x + m - 1) // m) * m


def _mlp_kernel(x_ref, w1_ref, b1_ref, w2_ref, b2_ref, w3_ref, b3_ref, o_ref):
    """Fused 3-layer MLP on one (TB, D) batch tile.

    Weights/biases are grid-invariant (index_map -> (0, 0)) so they stay
    VMEM-resident for the whole grid.  x is read from HBM in f32 and cast to
    bf16 on the VPU (which has slack); matmuls run bf16 on the MXU with f32
    accumulation; ReLU on the VPU; biases added in f32.
    """
    x = x_ref[...].astype(jnp.bfloat16)                                   # (TB, D)
    h1 = jnp.dot(x, w1_ref[...], preferred_element_type=jnp.float32) + b1_ref[...]
    h1 = jnp.maximum(h1, 0.0).astype(jnp.bfloat16)                        # (TB, 64)
    h2 = jnp.dot(h1, w2_ref[...], preferred_element_type=jnp.float32) + b2_ref[...]
    h2 = jnp.maximum(h2, 0.0).astype(jnp.bfloat16)                        # (TB, 32)
    out = jnp.dot(h2, w3_ref[...], preferred_element_type=jnp.float32) + b3_ref[...]
    # Lane-dense store: transpose the tiny (TB, 3) result to (3, TB) on the
    # otherwise-idle XLU so the store path is an unmasked vst.
    o_ref[...] = out.T.astype(o_ref.dtype)                                # (3, TB)


@functools.partial(jax.jit, static_argnames=("tb", "vmem_limit_bytes"))
def ohlcv_mlp_forward(x, params, tb=4096, vmem_limit_bytes=None):
    """x: (B, seq_len, input_size) or (B, D) float32. Returns (B, 3) float32."""
    B = x.shape[0]
    x2d = x.reshape(B, -1)            # nn.Flatten(); stays f32 (cast happens in-kernel)
    D = x2d.shape[1]

    w1, b1, w2, b2, w3, b3 = params   # all f32 (PyTorch semantics)
    # One-off bf16 cast of the few-KiB weights (not the streaming operand x).
    w1b = w1.astype(jnp.bfloat16)
    w2b = w2.astype(jnp.bfloat16)
    w3b = w3.astype(jnp.bfloat16)

    # Batch tile: multiple of 128 (lane-dense (3, TB) output blocks) and
    # capped so there are >=2 grid steps whenever B allows it (v7x megacore).
    tb = max(128, _round_up(tb, 128))
    two_steps = max(128, _round_up(pl.cdiv(B, 2), 128))
    TB = min(tb, two_steps)
    n_tiles = pl.cdiv(B, TB)          # ragged last input block handled by Pallas

    out_t = pl.pallas_call(
        _mlp_kernel,
        out_shape=jax.ShapeDtypeStruct((3, n_tiles * TB), jnp.float32),
        grid=(n_tiles,),
        in_specs=[
            pl.BlockSpec((TB, D), lambda i: (i, 0)),     # x: streamed f32 per tile
            pl.BlockSpec((D, 64), lambda i: (0, 0)),     # W1: VMEM-resident
            pl.BlockSpec((1, 64), lambda i: (0, 0)),     # b1
            pl.BlockSpec((64, 32), lambda i: (0, 0)),    # W2
            pl.BlockSpec((1, 32), lambda i: (0, 0)),     # b2
            pl.BlockSpec((32, 3), lambda i: (0, 0)),     # W3
            pl.BlockSpec((1, 3), lambda i: (0, 0)),      # b3
        ],
        out_specs=pl.BlockSpec((3, TB), lambda i: (0, i)),
        compiler_params=pltpu.CompilerParams(
            dimension_semantics=("parallel",),           # shard batch across v7x's 2 TCs
            vmem_limit_bytes=vmem_limit_bytes,           # only needed for tb >= 8192
        ),
    )(x2d, w1b, b1, w2b, b2, w3b, b3)

    return out_t[:, :B].T             # (B, 3) f32


def init_params(input_size, seq_len, key):
    """torch.nn.Linear-style init (uniform +/- 1/sqrt(fan_in)), all float32.

    Weights stored (in_features, out_features); biases as (1, out_features)
    rows (broadcast over the batch/sublane axis inside the kernel).
    """
    dims = [(input_size * seq_len, 64), (64, 32), (32, 3)]
    params = []
    for fan_in, fan_out in dims:
        key, kw, kb = jax.random.split(key, 3)
        bound = 1.0 / math.sqrt(fan_in)
        w = jax.random.uniform(kw, (fan_in, fan_out), jnp.float32, -bound, bound)
        b = jax.random.uniform(kb, (1, fan_out), jnp.float32, -bound, bound)
        params.extend([w, b])
    return tuple(params)


def _reference_forward_f32(x, params):
    """True float32 forward pass (matches the PyTorch module's numerics)."""
    w1, b1, w2, b2, w3, b3 = params
    h = x.reshape(x.shape[0], -1)
    h = jnp.maximum(h @ w1 + b1, 0.0)
    h = jnp.maximum(h @ w2 + b2, 0.0)
    return h @ w3 + b3


def _reference_forward_bf16(x, params):
    """Reference mirroring the kernel's precision (bf16 operands, f32 acc)."""
    w1, b1, w2, b2, w3, b3 = params
    xb = x.reshape(x.shape[0], -1).astype(jnp.bfloat16)
    h1 = jnp.maximum(
        jnp.dot(xb, w1.astype(jnp.bfloat16), preferred_element_type=jnp.float32) + b1, 0.0
    ).astype(jnp.bfloat16)
    h2 = jnp.maximum(
        jnp.dot(h1, w2.astype(jnp.bfloat16), preferred_element_type=jnp.float32) + b2, 0.0
    ).astype(jnp.bfloat16)
    return jnp.dot(h2, w3.astype(jnp.bfloat16), preferred_element_type=jnp.float32) + b3


if __name__ == "__main__":
    input_size = 5   # OHLCV features
    seq_len = 8
    batch = 2

    key = jax.random.PRNGKey(0)
    key, kx, kx2 = jax.random.split(key, 3)
    params = init_params(input_size, seq_len, key)

    # --- small demo batch (B=2, single grid step) ---
    x = jax.random.normal(kx, (batch, seq_len, input_size), jnp.float32)
    out = jax.block_until_ready(ohlcv_mlp_forward(x, params))
    assert out.shape == (batch, 3)
    assert jnp.allclose(out, _reference_forward_bf16(x, params), atol=2e-3, rtol=2e-3)
    assert jnp.allclose(out, _reference_forward_f32(x, params), atol=5e-2, rtol=5e-2)

    # --- multi-tile batch (2 grid steps, ragged last input block, no pad) ---
    big_batch = 1000
    xb = jax.random.normal(kx2, (big_batch, seq_len, input_size), jnp.float32)
    out_big = jax.block_until_ready(ohlcv_mlp_forward(xb, params))
    assert out_big.shape == (big_batch, 3)
    assert jnp.allclose(out_big, _reference_forward_bf16(xb, params), atol=2e-3, rtol=2e-3)
    assert jnp.allclose(out_big, _reference_forward_f32(xb, params), atol=5e-2, rtol=5e-2)

    print("KERNEL_OK")
</pallas_src>

<mosaic_0001>
module attributes {stable_mosaic.version = 11 : i64} {
  func.func @_mlp_kernel(%arg0: i32, %arg1: memref<128x40xf32, #tpu.memory_space<vmem>>, %arg2: memref<40x64xbf16, #tpu.memory_space<vmem>>, %arg3: memref<1x64xf32, #tpu.memory_space<vmem>>, %arg4: memref<64x32xbf16, #tpu.memory_space<vmem>>, %arg5: memref<1x32xf32, #tpu.memory_space<vmem>>, %arg6: memref<32x3xbf16, #tpu.memory_space<vmem>>, %arg7: memref<1x3xf32, #tpu.memory_space<vmem>>, %arg8: memref<3x128xf32, #tpu.memory_space<vmem>>) attributes {dimension_semantics = [#tpu.dimension_semantics<parallel>], iteration_bounds = array<i64: 1>, scalar_prefetch = 0 : i64, scratch_operands = 0 : i64, tpu.core_type = #tpu.core_type<tc>, window_params = [{transform_indices = @transform_0, window_bounds = array<i64: 128, 40>}, {pipeline_mode = #tpu.pipeline_mode<synchronous>, transform_indices = @transform_1, window_bounds = array<i64: 40, 64>}, {pipeline_mode = #tpu.pipeline_mode<synchronous>, transform_indices = @transform_2, window_bounds = array<i64: 1, 64>}, {pipeline_mode = #tpu.pipeline_mode<synchronous>, transform_indices = @transform_3, window_bounds = array<i64: 64, 32>}, {pipeline_mode = #tpu.pipeline_mode<synchronous>, transform_indices = @transform_4, window_bounds = array<i64: 1, 32>}, {pipeline_mode = #tpu.pipeline_mode<synchronous>, transform_indices = @transform_5, window_bounds = array<i64: 32, 3>}, {pipeline_mode = #tpu.pipeline_mode<synchronous>, transform_indices = @transform_6, window_bounds = array<i64: 1, 3>}, {transform_indices = @transform_7, window_bounds = array<i64: 3, 128>}]} {
    %c0 = arith.constant 0 : index
    %c0_0 = arith.constant 0 : index
    %0 = vector.load %arg1[%c0, %c0_0] : memref<128x40xf32, #tpu.memory_space<vmem>>, vector<128x40xf32>
    %1 = arith.truncf %0 : vector<128x40xf32> to vector<128x40xbf16>
    %c0_1 = arith.constant 0 : index
    %c0_2 = arith.constant 0 : index
    %2 = vector.load %arg2[%c0_1, %c0_2] : memref<40x64xbf16, #tpu.memory_space<vmem>>, vector<40x64xbf16>
    %cst = arith.constant dense<0.000000e+00> : vector<128x64xf32>
    %3 = tpu.matmul %1, %2, %cst {dimension_numbers = #tpu.dot_dimension_numbers<[1], [0], [0], [1], [0, 0, 1, 1], [], []>} : vector<128x40xbf16>, vector<40x64xbf16>, vector<128x64xf32> -> vector<128x64xf32>
    %c0_3 = arith.constant 0 : index
    %c0_4 = arith.constant 0 : index
    %4 = vector.load %arg3[%c0_3, %c0_4] : memref<1x64xf32, #tpu.memory_space<vmem>>, vector<1x64xf32>
    %5 = vector.broadcast %4 : vector<1x64xf32> to vector<128x64xf32>
    %6 = arith.addf %3, %5 : vector<128x64xf32>
    %cst_5 = arith.constant 0.000000e+00 : f32
    %7 = vector.broadcast %cst_5 : f32 to vector<128x64xf32>
    %8 = arith.maximumf %6, %7 : vector<128x64xf32>
    %9 = arith.truncf %8 : vector<128x64xf32> to vector<128x64xbf16>
    %c0_6 = arith.constant 0 : index
    %c0_7 = arith.constant 0 : index
    %10 = vector.load %arg4[%c0_6, %c0_7] : memref<64x32xbf16, #tpu.memory_space<vmem>>, vector<64x32xbf16>
    %cst_8 = arith.constant dense<0.000000e+00> : vector<128x32xf32>
    %11 = tpu.matmul %9, %10, %cst_8 {dimension_numbers = #tpu.dot_dimension_numbers<[1], [0], [0], [1], [0, 0, 1, 1], [], []>} : vector<128x64xbf16>, vector<64x32xbf16>, vector<128x32xf32> -> vector<128x32xf32>
    %c0_9 = arith.constant 0 : index
    %c0_10 = arith.constant 0 : index
    %12 = vector.load %arg5[%c0_9, %c0_10] : memref<1x32xf32, #tpu.memory_space<vmem>>, vector<1x32xf32>
    %13 = vector.broadcast %12 : vector<1x32xf32> to vector<128x32xf32>
    %14 = arith.addf %11, %13 : vector<128x32xf32>
    %cst_11 = arith.constant 0.000000e+00 : f32
    %15 = vector.broadcast %cst_11 : f32 to vector<128x32xf32>
    %16 = arith.maximumf %14, %15 : vector<128x32xf32>
    %17 = arith.truncf %16 : vector<128x32xf32> to vector<128x32xbf16>
    %c0_12 = arith.constant 0 : index
    %c0_13 = arith.constant 0 : index
    %18 = vector.load %arg6[%c0_12, %c0_13] : memref<32x3xbf16, #tpu.memory_space<vmem>>, vector<32x3xbf16>
    %cst_14 = arith.constant dense<0.000000e+00> : vector<128x3xf32>
    %19 = tpu.matmul %17, %18, %cst_14 {dimension_numbers = #tpu.dot_dimension_numbers<[1], [0], [0], [1], [0, 0, 1, 1], [], []>} : vector<128x32xbf16>, vector<32x3xbf16>, vector<128x3xf32> -> vector<128x3xf32>
    %c0_15 = arith.constant 0 : index
    %c0_16 = arith.constant 0 : index
    %20 = vector.load %arg7[%c0_15, %c0_16] : memref<1x3xf32, #tpu.memory_space<vmem>>, vector<1x3xf32>
    %21 = vector.broadcast %20 : vector<1x3xf32> to vector<128x3xf32>
    %22 = arith.addf %19, %21 : vector<128x3xf32>
    %23 = tpu.transpose %22, [1, 0] : vector<128x3xf32> -> vector<3x128xf32>
    %c0_17 = arith.constant 0 : index
    %c0_18 = arith.constant 0 : index
    %24 = vector.load %arg8[%c0_17, %c0_18] : memref<3x128xf32, #tpu.memory_space<vmem>>, vector<3x128xf32>
    tpu.vector_store %arg8[%c0_17, %c0_18], %23 {strides = array<i32>} : memref<3x128xf32, #tpu.memory_space<vmem>>, vector<3x128xf32>,
    return
  }
  func.func @transform_0(%arg0: i32) -> (i32, i32) {
    %c0_i32 = arith.constant 0 : i32
    %c0_i32_0 = arith.constant 0 : i32
    return %arg0, %c0_i32 : i32, i32
  }
  func.func @transform_1(%arg0: i32) -> (i32, i32) {
    %c0_i32 = arith.constant 0 : i32
    %c0_i32_0 = arith.constant 0 : i32
    %c0_i32_1 = arith.constant 0 : i32
    return %c0_i32, %c0_i32_0 : i32, i32
  }
  func.func @transform_2(%arg0: i32) -> (i32, i32) {
    %c0_i32 = arith.constant 0 : i32
    %c0_i32_0 = arith.constant 0 : i32
    %c0_i32_1 = arith.constant 0 : i32
    return %c0_i32, %c0_i32_0 : i32, i32
  }
  func.func @transform_3(%arg0: i32) -> (i32, i32) {
    %c0_i32 = arith.constant 0 : i32
    %c0_i32_0 = arith.constant 0 : i32
    %c0_i32_1 = arith.constant 0 : i32
    return %c0_i32, %c0_i32_0 : i32, i32
  }
  func.func @transform_4(%arg0: i32) -> (i32, i32) {
    %c0_i32 = arith.constant 0 : i32
    %c0_i32_0 = arith.constant 0 : i32
    %c0_i32_1 = arith.constant 0 : i32
    return %c0_i32, %c0_i32_0 : i32, i32
  }
  func.func @transform_5(%arg0: i32) -> (i32, i32) {
    %c0_i32 = arith.constant 0 : i32
    %c0_i32_0 = arith.constant 0 : i32
    %c0_i32_1 = arith.constant 0 : i32
    return %c0_i32, %c0_i32_0 : i32, i32
  }
  func.func @transform_6(%arg0: i32) -> (i32, i32) {
    %c0_i32 = arith.constant 0 : i32
    %c0_i32_0 = arith.constant 0 : i32
    %c0_i32_1 = arith.constant 0 : i32
    return %c0_i32, %c0_i32_0 : i32, i32
  }
  func.func @transform_7(%arg0: i32) -> (i32, i32) {
    %c0_i32 = arith.constant 0 : i32
    %c0_i32_0 = arith.constant 0 : i32
    return %c0_i32, %arg0 : i32, i32
  }
}

</mosaic_0001>

<bundles_post_ra>
// kernel: ohlcv_mlp_forward.1
= control target key start
LH: loop header
LB: loop body
LE: loop exit
PB: predicated region body
PF: predicated region fallthrough
CT: control target
= control target key end

     0   :  { %vm103_vm0 = vcmask 1043456   ;;  %vm78_vm1 = vcmask 326656   ;;  %vm267_vm2 = vcmask 523264   ;;  %vm436_vm3 = vcmask 261120   ;;  %s898_s1 = inlined_call_operand.vmem [shape: bf16[40,64], index: 1, kind: input, shape index: {}]   ;;  %s899_s0 = inlined_call_operand.vmem [shape: f32[2,40], index: 0, kind: input, shape index: {}]   ;;  %s900_s3 = inlined_call_operand.vmem [shape: bf16[64,32], index: 3, kind: input, shape index: {}]   ;;  %s901_s5 = inlined_call_operand.vmem [shape: bf16[32,3], index: 5, kind: input, shape index: {}]   ;;  %s902_s2 = inlined_call_operand.vmem [shape: f32[1,64], index: 2, kind: input, shape index: {}]   ;;  %s903_s4 = inlined_call_operand.vmem [shape: f32[1,32], index: 4, kind: input, shape index: {}]   ;;  %s904_s6 = inlined_call_operand.vmem [shape: f32[1,3], index: 6, kind: input, shape index: {}]   ;;  %s905_s7 = inlined_call_operand.vmem [shape: f32[3,128], index: 7, kind: output, shape index: {}]  }
   0x1   :  { %v738_v0 = vld [vmem:[%s898_s1 + $0x10] ss:$0 sps:$4 sm:$0xff]   ;;  %v739_v1 = vld [vmem:[%s898_s1 + $0x8] sm:$0xff]   ;;  %v27_v3 = vld [vmem:[%s899_s0] sm:$0xff] }
   0x2   :  { %736 = vmatprep.subr.msk.bf16.mxu0 %vm103_vm0, %v738_v0  ;;  %v105_v2 = vsel %vm103_vm0, %v738_v0, 0  ;;  %737 = vmatprep.subr.msk.bf16.mxu1 %vm103_vm0, %v738_v0  ;;  %v28_v4 = vld [vmem:[%s899_s0 + $0x8] sm:$0xff]  ;;  %v740_v5 = vld [vmem:[%s898_s1] sm:$0xff]   ;;  %v29_v7 = vld [vmem:[%s899_s0 + $0x10] sm:$0xff] }
   0x3   :  { %665 = vmatpush3.bf16.msra.mxu0 %v105_v2  ;;  %733 = vmatpush3.bf16.msra.mxu1 %v105_v2  ;;  %v43_v6 = vpack.c.bf16 %v28_v4, %v27_v3  ;;  %v30_v8 = vld [vmem:[%s899_s0 + $0x18] sm:$0xff]  ;;  %v35_v9 = vld [vmem:[%s899_s0 + $0x40] sm:$0xff]  ;;  %v36_v10 = vld [vmem:[%s899_s0 + $0x48] sm:$0xff] }
   0x4   :  { %666 = vmatprep.subr.bf16.mxu0 %v739_v1  ;;  %731 = vmatprep.subr.bf16.mxu1 %v739_v1  ;;  %v31_v11 = vld [vmem:[%s899_s0 + $0x20] sm:$0xff]  ;;  %v32_v12 = vld [vmem:[%s899_s0 + $0x28] sm:$0xff]  ;;  %v47_v13 = vpack.c.bf16 %v36_v10, %v35_v9  ;;  %v37_v14 = vld [vmem:[%s899_s0 + $0x50] sm:$0xff]  ;;  %v44_v19 = vpack.c.bf16 %v30_v8, %v29_v7 }
   0x5   :  { %670 = vmatprep.mubr.msk.bf16.mxu0 %vm78_vm1, %v43_v6  ;;  %v38_v15 = vld [vmem:[%s899_s0 + $0x58] sm:$0xff]  ;;  %v39_v16 = vld [vmem:[%s899_s0 + $0x60] sm:$0xff]  ;;  %v40_v17 = vld [vmem:[%s899_s0 + $0x68] sm:$0xff]  ;;  %v45_v21 = vpack.c.bf16 %v32_v12, %v31_v11 }
   0x6   :  { %v741_v18 = vld [vmem:[%s900_s3 + $0x18] sm:$0xff]   ;;  %678 = vmatprep.mubr.msk.bf16.mxu1 %vm78_vm1, %v47_v13  ;;  %v48_v20 = vpack.c.bf16 %v38_v15, %v37_v14  ;;  %v49_v22 = vpack.c.bf16 %v40_v17, %v39_v16  ;;  %v33_v23 = vld [vmem:[%s899_s0 + $0x30] sm:$0xff]  ;;  %v743_v30 = vld [vmem:[%s900_s3 + $0x8] sm:$0xff]  }
   0x7   :  { %667 = vmatpush3.bf16.msra.mxu0 %v739_v1  ;;  %734 = vmatpush3.bf16.msra.mxu1 %v739_v1  ;;  %v34_v24 = vld [vmem:[%s899_s0 + $0x38] sm:$0xff]  ;;  %v41_v25 = vld [vmem:[%s899_s0 + $0x70] sm:$0xff]  ;;  %v744_v31 = vld [vmem:[%s900_s3] sm:$0xff]  }
   0x8   :  { %668 = vmatprep.subr.bf16.mxu0 %v740_v5  ;;  %732 = vmatprep.subr.bf16.mxu1 %v740_v5  ;;  %v42_v26 = vld [vmem:[%s899_s0 + $0x78] sm:$0xff]  ;;  %v46_v27 = vpack.c.bf16 %v34_v24, %v33_v23  ;;  %v742_v29 = vld [vmem:[%s900_s3 + $0x10] sm:$0xff]   ;;  %v745_v32 = vld [vmem:[%s901_s5 + $0x8] sm:$0xff]  }
   0x9   :  { %v50_v28 = vpack.c.bf16 %v42_v26, %v41_v25  ;;  %v595_v37 = vld [vmem:[%s902_s2] ss:$0 sm:$0xff] }
   0xa   :  { %v746_v26 = vld [vmem:[%s901_s5] sm:$0xff]  }
   0xb   :  { %669 = vmatpush3.bf16.msra.mxu0 %v740_v5  ;;  %735 = vmatpush3.bf16.msra.mxu1 %v740_v5 }
   0xc   :  { %686 = vmatprep.subr.bf16.mxu1 %v741_v18  ;;  %710 = vmatprep.subr.bf16.mxu0 %v745_v32 }
   0xe   :  { %671 = vmatmul.mubr.msk.bf16.vlgmr.msra.gmra.mxu0 %vm78_vm1, %v44_v19  ;;  %679 = vmatmul.mubr.msk.bf16.vlgmr.msra.gmra.mxu1 %vm78_vm1, %v48_v20 }
   0xf   :  { %674 = vmatprep.mubr.msk.bf16.mxu0 %vm78_vm1, %v45_v21  ;;  %682 = vmatprep.mubr.msk.bf16.mxu1 %vm78_vm1, %v49_v22 }
  0x10   :  { %687 = vmatpush3.bf16.msra.mxu1 %v741_v18  ;;  %711 = vmatpush3.bf16.msra.mxu0 %v745_v32 }
  0x11   :  { %688 = vmatprep.subr.bf16.mxu1 %v742_v29  ;;  %712 = vmatprep.subr.bf16.mxu0 %v746_v26 }
  0x14   :  { %689 = vmatpush3.bf16.msra.mxu1 %v742_v29  ;;  %713 = vmatpush3.bf16.msra.mxu0 %v746_v26  ;;  %v607_v29 = vld [vmem:[%s903_s4] ss:$0 sm:$0xff] }
  0x15   :  { %690 = vmatprep.subr.bf16.mxu1 %v743_v30 }
  0x16   :  { %675 = vmatmul.mubr.msk.bf16.gmra.mxu0 %vm78_vm1, %v46_v27  ;;  %683 = vmatmul.mubr.msk.bf16.gmra.mxu1 %vm78_vm1, %v50_v28 }
  0x18   :  { %691 = vmatpush3.bf16.msra.mxu1 %v743_v30 }
  0x19   :  { %692 = vmatprep.subr.bf16.mxu1 %v744_v31 }
  0x1c   :  { %693 = vmatpush3.bf16.msra.mxu1 %v744_v31 }
  0xce   :  { %v672_v33 = vpop.f32.mrf.mxu0  ;;  %v680_v34 = vpop.f32.mrf.mxu1 }
  0xcf   :  { %v150_v42 = vadd.f32 %v672_v33, %v595_v37  ;;  %v182_v9 = vadd.f32 %v680_v34, %v595_v37 }
  0xd0   :  { %v141_v35 = vpop.f32.mrf.mxu0  ;;  %v173_v36 = vpop.f32.mrf.mxu1 }
  0xd1   :  { %v142_v40 = vadd.f32 %v595_v37, %v141_v35  ;;  %v206_v51 = vmax.f32 %v150_v42, 0.0  ;;  %v174_v54 = vadd.f32 %v595_v37, %v173_v36  ;;  %v214_v15 = vmax.f32 %v182_v9, 0.0 }
  0xd2   :  { %v673_v38 = vpop.f32.mrf.mxu0  ;;  %v681_v39 = vpop.f32.mrf.mxu1 }
  0xd3   :  { %v153_v41 = vadd.f32 %v673_v38, %v595_v37  ;;  %v204_v49 = vmax.f32 %v142_v40, 0.0  ;;  %v212_v1 = vmax.f32 %v174_v54, 0.0  ;;  %v185_v10 = vadd.f32 %v681_v39, %v595_v37 }
  0xd4   :  { %v144_v43 = vpop.f32.mrf.mxu0  ;;  %v176_v44 = vpop.f32.mrf.mxu1 }
  0xd5   :  { %v145_v45 = vadd.f32 %v595_v37, %v144_v43  ;;  %v207_v46 = vmax.f32 %v153_v41, 0.0  ;;  %v177_v58 = vadd.f32 %v595_v37, %v176_v44  ;;  %v215_v16 = vmax.f32 %v185_v10, 0.0 }
  0xd6   :  { %v676_v47 = vpop.f32.mrf.mxu0  ;;  %v684_v48 = vpop.f32.mrf.mxu1 }
  0xd7   :  { %v205_v50 = vmax.f32 %v145_v45, 0.0  ;;  %v166_v52 = vadd.f32 %v676_v47, %v595_v37  ;;  %v221_v59 = vpack.c.bf16 %v207_v46, %v206_v51  ;;  %v213_v5 = vmax.f32 %v177_v58, 0.0 }
  0xd8   :  { %v157_v53 = vpop.f32.mrf.mxu0  ;;  %v189_v55 = vpop.f32.mrf.mxu1  ;;  %v225_v19 = vpack.c.bf16 %v215_v16, %v214_v15  ;;  %v198_v20 = vadd.f32 %v684_v48, %v595_v37 }
  0xd9   :  { %v220_v56 = vpack.c.bf16 %v205_v50, %v204_v49  ;;  %v158_v57 = vadd.f32 %v595_v37, %v157_v53  ;;  %v210_v63 = vmax.f32 %v166_v52, 0.0  ;;  %v224_v12 = vpack.c.bf16 %v213_v5, %v212_v1 }
  0xda   :  { %v677_v60 = vpop.f32.mrf.mxu0  ;;  %v685_v61 = vpop.f32.mrf.mxu1  ;;  %v190_v13 = vadd.f32 %v595_v37, %v189_v55  ;;  %v218_v23 = vmax.f32 %v198_v20, 0.0 }
  0xdb   :  { %v169_v62 = vadd.f32 %v677_v60, %v595_v37  ;;  %694 = vmatprep.mubr.msk.bf16.mxu1 %vm267_vm2, %v220_v56  ;;  %v208_v2 = vmax.f32 %v158_v57, 0.0  ;;  %v201_v21 = vadd.f32 %v685_v61, %v595_v37 }
  0xdc   :  { %v160_v0 = vpop.f32.mrf.mxu0  ;;  %695 = vmatmul.mubr.msk.bf16.vlgmr.msra.gmra.mxu1 %vm267_vm2, %v221_v59  ;;  %v192_v6 = vpop.f32.mrf.mxu1  ;;  %v216_v17 = vmax.f32 %v190_v13, 0.0 }
  0xdd   :  { %v211_v3 = vmax.f32 %v169_v62, 0.0  ;;  %v161_v4 = vadd.f32 %v595_v37, %v160_v0  ;;  %v193_v14 = vadd.f32 %v595_v37, %v192_v6  ;;  %v219_v24 = vmax.f32 %v201_v21, 0.0  ;;  %v620_v21 = vld [vmem:[%s904_s6] ss:$0 sm:$0xff] }
  0xdf   :  { %v209_v7 = vmax.f32 %v161_v4, 0.0  ;;  %v223_v8 = vpack.c.bf16 %v211_v3, %v210_v63  ;;  %v217_v18 = vmax.f32 %v193_v14, 0.0  ;;  %v227_v25 = vpack.c.bf16 %v219_v24, %v218_v23 }
  0xe1   :  { %v222_v11 = vpack.c.bf16 %v209_v7, %v208_v2  ;;  %v226_v22 = vpack.c.bf16 %v217_v18, %v216_v17 }
  0xe3   :  { %698 = vmatprep.mubr.msk.bf16.mxu1 %vm267_vm2, %v222_v11 }
  0xe4   :  { %699 = vmatmul.mubr.msk.bf16.gmra.mxu1 %vm267_vm2, %v223_v8 }
  0xe5   :  { %702 = vmatprep.mubr.msk.bf16.mxu1 %vm267_vm2, %v224_v12 }
  0xec   :  { %703 = vmatmul.mubr.msk.bf16.gmra.mxu1 %vm267_vm2, %v225_v19 }
  0xed   :  { %706 = vmatprep.mubr.msk.bf16.mxu1 %vm267_vm2, %v226_v22 }
  0xf4   :  { %707 = vmatmul.mubr.msk.bf16.gmra.mxu1 %vm267_vm2, %v227_v25 }
 0x19c   :  { %v696_v27 = vpop.f32.mrf.mxu1 }
 0x19d   :  { %v335_v33 = vadd.f32 %v696_v27, %v607_v29 }
 0x19e   :  { %v326_v28 = vpop.f32.mrf.mxu1 }
 0x19f   :  { %v327_v31 = vadd.f32 %v607_v29, %v326_v28  ;;  %v391_v40 = vmax.f32 %v335_v33, 0.0 }
 0x1a0   :  { %v697_v30 = vpop.f32.mrf.mxu1 }
 0x1a1   :  { %v338_v32 = vadd.f32 %v697_v30, %v607_v29  ;;  %v389_v38 = vmax.f32 %v327_v31, 0.0 }
 0x1a2   :  { %v329_v34 = vpop.f32.mrf.mxu1 }
 0x1a3   :  { %v330_v35 = vadd.f32 %v607_v29, %v329_v34  ;;  %v392_v36 = vmax.f32 %v338_v32, 0.0 }
 0x1a4   :  { %v700_v37 = vpop.f32.mrf.mxu1 }
 0x1a5   :  { %v390_v39 = vmax.f32 %v330_v35, 0.0  ;;  %v406_v43 = vpack.c.bf16 %v392_v36, %v391_v40  ;;  %v351_v47 = vadd.f32 %v700_v37, %v607_v29 }
 0x1a6   :  { %v342_v41 = vpop.f32.mrf.mxu1 }
 0x1a7   :  { %v405_v42 = vpack.c.bf16 %v390_v39, %v389_v38  ;;  %v343_v45 = vadd.f32 %v607_v29, %v342_v41  ;;  %v395_v54 = vmax.f32 %v351_v47, 0.0 }
 0x1a8   :  { %v701_v44 = vpop.f32.mrf.mxu1 }
 0x1a9   :  { %v354_v46 = vadd.f32 %v701_v44, %v607_v29  ;;  %714 = vmatprep.mubr.msk.bf16.mxu0 %vm436_vm3, %v405_v42  ;;  %v393_v52 = vmax.f32 %v343_v45, 0.0 }
 0x1aa   :  { %v345_v48 = vpop.f32.mrf.mxu1  ;;  %715 = vmatmul.mubr.msk.bf16.vlgmr.msra.gmra.mxu0 %vm436_vm3, %v406_v43 }
 0x1ab   :  { %v346_v49 = vadd.f32 %v607_v29, %v345_v48  ;;  %v396_v50 = vmax.f32 %v354_v46, 0.0 }
 0x1ac   :  { %v704_v51 = vpop.f32.mrf.mxu1 }
 0x1ad   :  { %v394_v53 = vmax.f32 %v346_v49, 0.0  ;;  %v367_v55 = vadd.f32 %v704_v51, %v607_v29  ;;  %v408_v59 = vpack.c.bf16 %v396_v50, %v395_v54 }
 0x1ae   :  { %v358_v56 = vpop.f32.mrf.mxu1 }
 0x1af   :  { %v407_v57 = vpack.c.bf16 %v394_v53, %v393_v52  ;;  %v359_v58 = vadd.f32 %v607_v29, %v358_v56  ;;  %v399_v62 = vmax.f32 %v367_v55, 0.0 }
 0x1b0   :  { %v705_v60 = vpop.f32.mrf.mxu1 }
 0x1b1   :  { %v370_v61 = vadd.f32 %v705_v60, %v607_v29  ;;  %718 = vmatprep.mubr.msk.bf16.mxu0 %vm436_vm3, %v407_v57  ;;  %v397_v0 = vmax.f32 %v359_v58, 0.0 }
 0x1b2   :  { %v361_v63 = vpop.f32.mrf.mxu1  ;;  %719 = vmatmul.mubr.msk.bf16.gmra.mxu0 %vm436_vm3, %v408_v59 }
 0x1b3   :  { %v400_v1 = vmax.f32 %v370_v61, 0.0  ;;  %v362_v2 = vadd.f32 %v607_v29, %v361_v63 }
 0x1b4   :  { %v708_v3 = vpop.f32.mrf.mxu1 }
 0x1b5   :  { %v398_v4 = vmax.f32 %v362_v2, 0.0  ;;  %v410_v5 = vpack.c.bf16 %v400_v1, %v399_v62  ;;  %v383_v6 = vadd.f32 %v708_v3, %v607_v29 }
 0x1b6   :  { %v374_v7 = vpop.f32.mrf.mxu1 }
 0x1b7   :  { %v409_v8 = vpack.c.bf16 %v398_v4, %v397_v0  ;;  %v375_v9 = vadd.f32 %v607_v29, %v374_v7  ;;  %v403_v12 = vmax.f32 %v383_v6, 0.0 }
 0x1b8   :  { %v709_v10 = vpop.f32.mrf.mxu1 }
 0x1b9   :  { %722 = vmatprep.mubr.msk.bf16.mxu0 %vm436_vm3, %v409_v8  ;;  %v386_v11 = vadd.f32 %v709_v10, %v607_v29  ;;  %v401_v14 = vmax.f32 %v375_v9, 0.0 }
 0x1ba   :  { %723 = vmatmul.mubr.msk.bf16.gmra.mxu0 %vm436_vm3, %v410_v5  ;;  %v377_v13 = vpop.f32.mrf.mxu1 }
 0x1bb   :  { %v404_v15 = vmax.f32 %v386_v11, 0.0  ;;  %v378_v16 = vadd.f32 %v607_v29, %v377_v13 }
 0x1bd   :  { %v402_v17 = vmax.f32 %v378_v16, 0.0  ;;  %v412_v18 = vpack.c.bf16 %v404_v15, %v403_v12 }
 0x1bf   :  { %v411_v19 = vpack.c.bf16 %v402_v17, %v401_v14 }
 0x1c1   :  { %726 = vmatprep.mubr.msk.bf16.mxu0 %vm436_vm3, %v411_v19 }
 0x1c2   :  { %727 = vmatmul.mubr.msk.bf16.gmra.mxu0 %vm436_vm3, %v412_v18 }
 0x26a   :  { %v716_v20 = vpop.f32.mrf.mxu0 }
 0x26b   :  { %v504_v28 = vadd.f32 %v716_v20, %v620_v21 }
 0x26c   :  { %v495_v22 = vpop.f32.mrf.mxu0 }
 0x26d   :  { %v496_v23 = vadd.f32 %v620_v21, %v495_v22 }
 0x26e   :  { %v717_v24 = vpop.f32.mrf.mxu0 }
 0x26f   :  { %558 = vxpose.xlu0.b32.start [1/16] (narrow) %v496_v23, 8  ;;  %v507_v30 = vadd.f32 %v717_v24, %v620_v21 }
 0x270   :  { %v498_v25 = vpop.f32.mrf.mxu0 }
 0x271   :  { %v499_v26 = vadd.f32 %v620_v21, %v498_v25 }
 0x272   :  { %v720_v27 = vpop.f32.mrf.mxu0 }
 0x273   :  { %559 = vxpose.xlu0.b32.cont [2/16] (narrow) %v499_v26, 8  ;;  %v520_v36 = vadd.f32 %v720_v27, %v620_v21 }
 0x274   :  { %v511_v29 = vpop.f32.mrf.mxu0 }
 0x275   :  { %v512_v32 = vadd.f32 %v620_v21, %v511_v29 }
 0x276   :  { %v721_v31 = vpop.f32.mrf.mxu0 }
 0x277   :  { %560 = vxpose.xlu0.b32.cont [3/16] (narrow) %v504_v28, 8  ;;  %v523_v38 = vadd.f32 %v721_v31, %v620_v21 }
 0x278   :  { %v514_v33 = vpop.f32.mrf.mxu0 }
 0x279   :  { %v515_v34 = vadd.f32 %v620_v21, %v514_v33 }
 0x27a   :  { %v724_v35 = vpop.f32.mrf.mxu0 }
 0x27b   :  { %561 = vxpose.xlu0.b32.cont [4/16] (narrow) %v507_v30, 8  ;;  %v536_v44 = vadd.f32 %v724_v35, %v620_v21 }
 0x27c   :  { %v527_v37 = vpop.f32.mrf.mxu0 }
 0x27d   :  { %v528_v40 = vadd.f32 %v620_v21, %v527_v37 }
 0x27e   :  { %v725_v39 = vpop.f32.mrf.mxu0 }
 0x27f   :  { %562 = vxpose.xlu0.b32.cont [5/16] (narrow) %v512_v32, 8  ;;  %v539_v46 = vadd.f32 %v725_v39, %v620_v21 }
 0x280   :  { %v530_v41 = vpop.f32.mrf.mxu0 }
 0x281   :  { %v531_v42 = vadd.f32 %v620_v21, %v530_v41 }
 0x282   :  { %v728_v43 = vpop.f32.mrf.mxu0 }
 0x283   :  { %563 = vxpose.xlu0.b32.cont [6/16] (narrow) %v515_v34, 8  ;;  %v552_v51 = vadd.f32 %v728_v43, %v620_v21 }
 0x284   :  { %v543_v45 = vpop.f32.mrf.mxu0 }
 0x285   :  { %v544_v48 = vadd.f32 %v620_v21, %v543_v45 }
 0x286   :  { %v729_v47 = vpop.f32.mrf.mxu0 }
 0x287   :  { %564 = vxpose.xlu0.b32.cont [7/16] (narrow) %v520_v36, 8  ;;  %v555_v52 = vadd.f32 %v729_v47, %v620_v21 }
 0x288   :  { %v546_v49 = vpop.f32.mrf.mxu0 }
 0x289   :  { %v547_v50 = vadd.f32 %v620_v21, %v546_v49 }
 0x28b   :  { %565 = vxpose.xlu0.b32.cont [8/16] (narrow) %v523_v38, 8 }
 0x28f   :  { %566 = vxpose.xlu0.b32.cont [9/16] (narrow) %v528_v40, 8 }
 0x293   :  { %567 = vxpose.xlu0.b32.cont [10/16] (narrow) %v531_v42, 8 }
 0x297   :  { %568 = vxpose.xlu0.b32.cont [11/16] (narrow) %v536_v44, 8 }
 0x29b   :  { %569 = vxpose.xlu0.b32.cont [12/16] (narrow) %v539_v46, 8 }
 0x29f   :  { %570 = vxpose.xlu0.b32.cont [13/16] (narrow) %v544_v48, 8 }
 0x2a3   :  { %571 = vxpose.xlu0.b32.cont [14/16] (narrow) %v547_v50, 8 }
 0x2a7   :  { %572 = vxpose.xlu0.b32.cont [15/16] (narrow) %v552_v51, 8 }
 0x2ab   :  { %573 = vxpose.xlu0.b32.end [16/16] (narrow) %v555_v52, 8 }
 0x2eb   :  { %v574_v53 = vpop.trf.xlu0 }
 0x2ec   :  { %590 = vst [vmem:[%s905_s7] sm:$0x7] %v574_v53 }

</bundles_post_ra>
